<compile_context>
chip_gen: v5e
topology: v5e:2x2
jax: 0.10.0
libtpu: 0.0.40
codegen_flags: <defaults>
</compile_context>

<pallas_src>
import math

import jax
import jax.numpy as jnp
from jax.experimental import pallas as pl
from jax.experimental.pallas import tpu as pltpu


# ---------------------------------------------------------------------------
# pe buffer construction (matches the torch module's __init__, flattened to 2D)
# ---------------------------------------------------------------------------
def make_pe_buffer(d_model: int, max_len: int = 5000, dtype=jnp.float32):
    position = jnp.arange(max_len, dtype=jnp.float32)[:, None]                 # (max_len, 1)
    div_term = jnp.exp(
        jnp.arange(0, d_model, 2, dtype=jnp.float32) * (-math.log(10000.0) / d_model)
    )                                                                          # (d_model//2,)
    angles = position * div_term                                               # (max_len, d_model//2)
    pe = jnp.zeros((max_len, d_model), dtype=jnp.float32)
    pe = pe.at[:, 0::2].set(jnp.sin(angles))
    pe = pe.at[:, 1::2].set(jnp.cos(angles))
    return pe.astype(dtype)                                                    # (max_len, d_model)


def prepare_pe_row(pe: jax.Array, batch: int, dtype) -> jax.Array:
    """Init-time (hoisted) slice/cast/flatten: pe[:batch] -> (1, batch*d_model)."""
    return pe[:batch].astype(dtype).reshape(1, -1)


# ---------------------------------------------------------------------------
# Kernels
# ---------------------------------------------------------------------------
def _kernel_eval(x_ref, pe_ref, o_ref):
    # x_ref/o_ref: (TS, B*D) streamed tile; pe_ref: (1, B*D), resident across the grid.
    o_ref[...] = (x_ref[...] + pe_ref[...]).astype(o_ref.dtype)


def _make_dropout_kernel_tpu_prng(dropout_p: float):
    """Fused dropout via the on-chip PRNG (TPU hardware path, single HBM pass)."""
    keep_scale = 1.0 / (1.0 - dropout_p)
    # Drop iff raw 32-bit word < p * 2^32 (single unsigned compare; no 24-bit masking).
    threshold = min(int(round(dropout_p * float(1 << 32))), (1 << 32) - 1)

    def kernel(seed_ref, x_ref, pe_ref, o_ref):
        # Per-tile seed -> result is identical regardless of which TensorCore runs the tile.
        pltpu.prng_seed(seed_ref[0] + pl.program_id(0))
        raw = pltpu.prng_random_bits(x_ref.shape)
        bits = raw if raw.dtype == jnp.uint32 else pltpu.bitcast(raw, jnp.uint32)
        keep = bits >= jnp.uint32(threshold)
        y = x_ref[...] + pe_ref[...]
        scale = jnp.where(keep, keep_scale, 0.0).astype(y.dtype)   # scale folded into select
        o_ref[...] = (y * scale).astype(o_ref.dtype)

    return kernel


def _make_dropout_kernel_external_bits(dropout_p: float):
    """Portable dropout: random words generated outside and streamed through the grid."""
    keep_scale = 1.0 / (1.0 - dropout_p)
    threshold = min(int(round(dropout_p * float(1 << 32))), (1 << 32) - 1)

    def kernel(x_ref, pe_ref, bits_ref, o_ref):
        keep = bits_ref[...] >= jnp.uint32(threshold)
        y = x_ref[...] + pe_ref[...]
        scale = jnp.where(keep, keep_scale, 0.0).astype(y.dtype)
        o_ref[...] = (y * scale).astype(o_ref.dtype)

    return kernel


# ---------------------------------------------------------------------------
# Tile sizing
# ---------------------------------------------------------------------------
def _choose_block_rows(S: int, BD: int, itemsize: int, *,
                       target_tile_bytes: int = 6 * 1024 * 1024,
                       min_tile_bytes: int = 1 * 1024 * 1024,
                       min_grid_steps: int = 8) -> int:
    """Row count for (rows, B*D) tiles.

    * rows is a multiple of the dtype's sublane packing (8 f32, 16 bf16, 32 int8/fp8).
    * tiles target ~6 MiB (amortizes the ~0.35 us per-grid-step overhead at 3.2 TB/s),
    * but rows are also capped so the grid has >= min_grid_steps steps (>= 4 per
      TensorCore on v7x) as long as each tile stays >= ~1 MiB,
    * if the whole seq axis fits in one tile we use the full dim (always a legal block).
    """
    sub = max(8, 32 // max(itemsize, 1))
    row_bytes = max(BD * itemsize, 1)

    def floor_mult(v):
        return max((v // sub) * sub, sub)

    def ceil_mult(v):
        return max(-(-v // sub) * sub, sub)

    rows_target = floor_mult(target_tile_bytes // row_bytes)
    rows_split = ceil_mult(-(-S // min_grid_steps))
    rows_floor = floor_mult(min_tile_bytes // row_bytes)
    rows = min(rows_target, max(rows_split, rows_floor))
    if rows >= S:
        return S
    return rows


# ---------------------------------------------------------------------------
# Forward wrapper
# ---------------------------------------------------------------------------
def positional_encoding_forward(x: jax.Array, pe_row: jax.Array, *,
                                dropout_p: float = 0.01, training: bool = False,
                                seed: int = 0,
                                target_tile_bytes: int = 6 * 1024 * 1024,
                                vmem_limit_bytes: int = 48 * 1024 * 1024) -> jax.Array:
    """x: [seq_len, batch, d_model]; pe_row: [1, batch*d_model] (from prepare_pe_row)."""
    S, B, D = x.shape
    BD = B * D
    assert pe_row.shape == (1, BD), f"pe_row must be (1, {BD}), got {pe_row.shape}"
    pe_row = pe_row.astype(x.dtype)              # no-op when prepared with the right dtype
    x2 = x.reshape(S, BD)                        # contiguous reshape: free layout plumbing

    itemsize = jnp.dtype(x.dtype).itemsize
    ts = _choose_block_rows(S, BD, itemsize, target_tile_bytes=target_tile_bytes)
    grid = (pl.cdiv(S, ts),)

    apply_dropout = bool(training) and float(dropout_p) > 0.0
    # The stateful TPU PRNG only lowers under Mosaic; fall back to streamed bits elsewhere.
    use_tpu_prng = apply_dropout and jax.default_backend() == "tpu"

    if use_tpu_prng:
        nsp = 1
        idx_stream = lambda i, seed_ref: (i, 0)
        idx_pe = lambda i, seed_ref: (0, 0)
    else:
        nsp = 0
        idx_stream = lambda i: (i, 0)
        idx_pe = lambda i: (0, 0)

    x_spec = pl.BlockSpec((ts, BD), idx_stream)      # streamed seq tiles
    pe_spec = pl.BlockSpec((1, BD), idx_pe)          # pe resident in VMEM across the grid
    out_spec = pl.BlockSpec((ts, BD), idx_stream)

    in_specs = [x_spec, pe_spec]
    inputs = [x2, pe_row]
    bytes_accessed = 2 * S * BD * itemsize + BD * itemsize
    flops = S * BD

    if apply_dropout:
        flops = 3 * S * BD
        if use_tpu_prng:
            kernel = _make_dropout_kernel_tpu_prng(float(dropout_p))
            inputs = [jnp.asarray([seed], dtype=jnp.int32)] + inputs      # seed -> SMEM
        else:
            kernel = _make_dropout_kernel_external_bits(float(dropout_p))
            bits = jax.random.bits(jax.random.PRNGKey(seed), (S, BD), dtype=jnp.uint32)
            in_specs = in_specs + [pl.BlockSpec((ts, BD), idx_stream)]
            inputs = inputs + [bits]
            bytes_accessed += S * BD * 4
    else:
        kernel = _kernel_eval

    out2 = pl.pallas_call(
        kernel,
        out_shape=jax.ShapeDtypeStruct((S, BD), x.dtype),
        grid_spec=pltpu.PrefetchScalarGridSpec(
            num_scalar_prefetch=nsp,
            grid=grid,
            in_specs=in_specs,
            out_specs=out_spec,
        ),
        compiler_params=pltpu.CompilerParams(
            dimension_semantics=("parallel",),        # v7x: shard seq tiles over 2 TCs
            vmem_limit_bytes=vmem_limit_bytes,        # clears v5e's 16 MiB default scoped limit
        ),
        cost_estimate=pl.CostEstimate(
            flops=flops, bytes_accessed=bytes_accessed, transcendentals=0),
    )(*inputs)

    return out2.reshape(S, B, D)


# ---------------------------------------------------------------------------
# Pure-JAX reference (mirrors the PyTorch code, eval mode)
# ---------------------------------------------------------------------------
def _reference_forward(x, pe):
    xb = jnp.transpose(x, (1, 0, 2))                  # [B, S, D]
    xb = xb + pe[: xb.shape[0]][:, None, :]           # + pe[:B] broadcast over seq
    return jnp.transpose(xb, (1, 0, 2))               # [S, B, D]


if __name__ == "__main__":
    seq_len, batch, d_model = 8, 2, 32
    key = jax.random.PRNGKey(0)
    x = jax.random.normal(key, (seq_len, batch, d_model), dtype=jnp.float32)

    # Init-time work (register_buffer analogue): build pe, then the pre-sliced / pre-cast
    # / pre-flattened row used by the kernel (hoisted out of the per-call path).
    pe = make_pe_buffer(d_model, max_len=5000)
    pe_row = prepare_pe_row(pe, batch, x.dtype)

    # Eval mode (nn.Dropout is identity): must match the pure-JAX reference exactly.
    out = positional_encoding_forward(x, pe_row, dropout_p=0.01, training=False)
    out = jax.block_until_ready(out)
    ref = _reference_forward(x, pe)
    assert out.shape == (seq_len, batch, d_model)
    assert jnp.allclose(out, ref, atol=1e-6, rtol=1e-6)

    # Training mode: dropout fused into the same kernel (on-chip PRNG on TPU; streamed
    # precomputed bits on non-TPU/interpret backends).
    p = 0.01
    out_tr = positional_encoding_forward(x, pe_row, dropout_p=p, training=True, seed=123)
    out_tr = jax.block_until_ready(out_tr)
    assert out_tr.shape == (seq_len, batch, d_model)
    kept = out_tr != 0.0
    dropped_frac = 1.0 - jnp.mean(kept.astype(jnp.float32))
    assert dropped_frac < 0.2                          # p=0.01 -> expect ~1% dropped
    scaled_ref = ref / (1.0 - p)
    assert jnp.allclose(jnp.where(kept, out_tr, 0.0),
                        jnp.where(kept, scaled_ref, 0.0), atol=1e-5, rtol=1e-5)

    print("KERNEL_OK")
</pallas_src>

<mosaic_0001>
module attributes {stable_mosaic.version = 11 : i64} {
  func.func @_kernel_eval(%arg0: i32, %arg1: memref<8x64xf32, #tpu.memory_space<vmem>>, %arg2: memref<1x64xf32, #tpu.memory_space<vmem>>, %arg3: memref<8x64xf32, #tpu.memory_space<vmem>>) attributes {dimension_semantics = [#tpu.dimension_semantics<parallel>], iteration_bounds = array<i64: 1>, scalar_prefetch = 0 : i64, scratch_operands = 0 : i64, tpu.core_type = #tpu.core_type<tc>, window_params = [{transform_indices = @transform_0, window_bounds = array<i64: 8, 64>}, {pipeline_mode = #tpu.pipeline_mode<synchronous>, transform_indices = @transform_1, window_bounds = array<i64: 1, 64>}, {transform_indices = @transform_2, window_bounds = array<i64: 8, 64>}]} {
    %c0 = arith.constant 0 : index
    %c0_0 = arith.constant 0 : index
    %0 = vector.load %arg1[%c0, %c0_0] : memref<8x64xf32, #tpu.memory_space<vmem>>, vector<8x64xf32>
    %c0_1 = arith.constant 0 : index
    %c0_2 = arith.constant 0 : index
    %1 = vector.load %arg2[%c0_1, %c0_2] : memref<1x64xf32, #tpu.memory_space<vmem>>, vector<1x64xf32>
    %2 = vector.broadcast %1 : vector<1x64xf32> to vector<8x64xf32>
    %3 = arith.addf %0, %2 : vector<8x64xf32>
    %c0_3 = arith.constant 0 : index
    %c0_4 = arith.constant 0 : index
    %4 = vector.load %arg3[%c0_3, %c0_4] : memref<8x64xf32, #tpu.memory_space<vmem>>, vector<8x64xf32>
    tpu.vector_store %arg3[%c0_3, %c0_4], %3 {strides = array<i32>} : memref<8x64xf32, #tpu.memory_space<vmem>>, vector<8x64xf32>,
    return
  }
  func.func @transform_0(%arg0: i32) -> (i32, i32) {
    %c0_i32 = arith.constant 0 : i32
    %c0_i32_0 = arith.constant 0 : i32
    return %arg0, %c0_i32 : i32, i32
  }
  func.func @transform_1(%arg0: i32) -> (i32, i32) {
    %c0_i32 = arith.constant 0 : i32
    %c0_i32_0 = arith.constant 0 : i32
    %c0_i32_1 = arith.constant 0 : i32
    return %c0_i32, %c0_i32_0 : i32, i32
  }
  func.func @transform_2(%arg0: i32) -> (i32, i32) {
    %c0_i32 = arith.constant 0 : i32
    %c0_i32_0 = arith.constant 0 : i32
    return %arg0, %c0_i32 : i32, i32
  }
}

</mosaic_0001>

<bundles_post_ra>
// kernel: tpu_custom_call.1
= control target key start
LH: loop header
LB: loop body
LE: loop exit
PB: predicated region body
PF: predicated region fallthrough
CT: control target
= control target key end

     0   :  { %7 = vsyncpa [#allocation3], 0  ;;  %s175_s0 = inlined_call_operand.hbm [shape: f32[8,64], index: 0, kind: input, shape index: {}]   ;;  %s176_s1 = inlined_call_operand.hbm [shape: f32[1,64], index: 1, kind: input, shape index: {}]   ;;  %s177_s2 = inlined_call_operand.hbm [shape: f32[8,64], index: 2, kind: output, shape index: {}]  }
   0x1   :  { %8 = vsyncpa [#allocation6], 0 }
   0x2   :  { %9 = vsyncpa [#allocation4], 0  ;;  %s15_s11 = sshll.u32 %s175_s0, 4  ;;  %s148_s12 = smov [#allocation2]   ;;  %s16_s11 = int_to_ptr.hbm [resolvable:$true] %s15_s11 }
   0x3   :  { %s17_s13 = sshll.u32 %s148_s12, 4  ;;  %s26_s16 = sshll.u32 %s176_s1, 4  ;;  %s18_s13 = int_to_ptr.vmem [resolvable:$true] %s17_s13  ;;  %s27_s16 = int_to_ptr.hbm [resolvable:$true] %s26_s16 }
   0x4   :  { %20 = dma.hbm_to_vmem [thread:$0]  %s16_s11, 128, %s18_s13, [#allocation3]  }
   0x5   :  { %s149_s17 = smov [#allocation5]  }
   0x6   :  { %s28_s18 = sshll.u32 %s149_s17, 4  ;;  %s29_s18 = int_to_ptr.vmem [resolvable:$true] %s28_s18 }
   0x7   :  { %31 = dma.hbm_to_vmem [thread:$0]  %s27_s16, 16, %s29_s18, [#allocation6]  }
   0x8   :  { %142 = dma.done.wait [#allocation3], 128  }
   0x9   :  { %143 = vsyncadd [#allocation3], 4294967168 }
   0xa   :  { %144 = dma.done.wait [#allocation6], 16  }
   0xb   :  { %145 = vsyncadd [#allocation6], 4294967280  ;;  %s150_s19 = smov [#allocation7]   ;;  %s55_s22 = sshll.u32 %s177_s2, 4  ;;  %v40_v0 = vld [vmem:[#allocation2] sm:$0xff]  ;;  %vm46_vm0 = vcmask 523264   ;;  %s56_s22 = int_to_ptr.hbm [resolvable:$true] %s55_s22 }
   0xc   :  { %s53_s0 = sshll.u32 %s150_s19, 4  ;;  %v69_v1 = vld [vmem:[#allocation5] ss:$0 sm:$0xff]  ;;  %s54_s0 = int_to_ptr.vmem [resolvable:$true] %s53_s0 }
   0xd   :  { %v45_v2 = vadd.f32 %v69_v1, %v40_v0 }
   0xf   :  { %47 = vst.msk [vmem:[#allocation7] sm:$0xff] %vm46_vm0, %v45_v2 }
  0x10   :  { %58 = dma.vmem_to_hbm [thread:$0]  %s54_s0, 128, %s56_s22, [#allocation4]  }
  0x11   :  { %146 = dma.done.wait [#allocation4], 128  }
  0x12   :  { %147 = vsyncadd [#allocation4], 4294967168 }
  0x13   :  { %63 = vsyncpa [#allocation3], 1 }
  0x14   :  { %64 = vsyncpa [#allocation6], 1 }
  0x15   :  { %65 = vsyncpa [#allocation4], 1 }

</bundles_post_ra>
